<compile_context>
chip_gen: v5e
topology: v5e:2x2
jax: 0.10.0
libtpu: 0.0.40
codegen_flags: <defaults>
</compile_context>

<pallas_src>
import jax
import jax.numpy as jnp
from jax.experimental import pallas as pl
from jax.experimental.pallas import tpu as pltpu


def _mlp_kernel(x_ref, w1_ref, b1_ref, w2_ref, b2_ref, o_ref):
    # x:  (TB, obs)        w1: (obs, hidden)      b1: (1, hidden)
    # w2: (hidden, nact)   b2: (1, nact)          o:  (TB, nact)
    h = jnp.dot(x_ref[...], w1_ref[...], preferred_element_type=jnp.float32)
    h = jnp.maximum(h + b1_ref[...], 0.0)                     # bias + ReLU (f32, VPU)
    y = jnp.dot(h, w2_ref[...], preferred_element_type=jnp.float32)
    o_ref[...] = (y + b2_ref[...]).astype(o_ref.dtype)        # narrow (nact) store, no padding


def _round_up(v, m):
    return ((v + m - 1) // m) * m


def prepare_params(w1, b1, w2, b2):
    """One-time parameter prep (do this at init / load, NOT per forward call)."""
    f32 = jnp.float32
    return (w1.astype(f32),
            b1.reshape(1, -1).astype(f32),
            w2.astype(f32),
            b2.reshape(1, -1).astype(f32))


def net_forward(x, w1, b1_2d, w2, b2_2d, *, tb=512, split_for_megacore=True):
    """Forward pass of Net. x: (B, obs) -> (B, n_actions) f32.

    Params must already be prepared with prepare_params (biases 2-D, f32).
    """
    B, obs = x.shape
    hidden = w1.shape[1]
    n_actions = w2.shape[1]

    # Batch tile: multiple of 8 (sublane), capped for v7x VMEM, no batch padding.
    tb = max(8, min(_round_up(tb, 8), 8192))
    TB = min(tb, _round_up(B, 8))
    if split_for_megacore and B >= 16:
        # Ensure >= 2 grid steps so ("parallel",) can use both TCs on v7x.
        TB = min(TB, _round_up(pl.cdiv(B, 2), 8))

    grid = (pl.cdiv(B, TB),)
    x = x.astype(jnp.float32)

    out = pl.pallas_call(
        _mlp_kernel,
        out_shape=jax.ShapeDtypeStruct((B, n_actions), jnp.float32),
        grid=grid,
        in_specs=[
            pl.BlockSpec((TB, obs), lambda i: (i, 0)),          # stream activations
            pl.BlockSpec((obs, hidden), lambda i: (0, 0)),      # weights stay resident
            pl.BlockSpec((1, hidden), lambda i: (0, 0)),
            pl.BlockSpec((hidden, n_actions), lambda i: (0, 0)),
            pl.BlockSpec((1, n_actions), lambda i: (0, 0)),
        ],
        out_specs=pl.BlockSpec((TB, n_actions), lambda i: (i, 0)),
        compiler_params=pltpu.CompilerParams(
            dimension_semantics=("parallel",)),                 # 2-TC batch shard on v7x
    )(x, w1, b1_2d, w2, b2_2d)

    return out


def init_params(key, obs_size, hidden_size, n_actions):
    # Deterministic synthetic init (PyTorch-style uniform bound 1/sqrt(fan_in)).
    k1, k2, k3, k4 = jax.random.split(key, 4)
    bound1 = 1.0 / jnp.sqrt(obs_size)
    bound2 = 1.0 / jnp.sqrt(hidden_size)
    w1 = jax.random.uniform(k1, (obs_size, hidden_size), jnp.float32, -bound1, bound1)
    b1 = jax.random.uniform(k2, (hidden_size,), jnp.float32, -bound1, bound1)
    w2 = jax.random.uniform(k3, (hidden_size, n_actions), jnp.float32, -bound2, bound2)
    b2 = jax.random.uniform(k4, (n_actions,), jnp.float32, -bound2, bound2)
    return w1, b1, w2, b2


if __name__ == "__main__":
    obs_size = 4
    hidden_size = 128
    n_actions = 10
    batch = 64   # small; with the megacore split this still exercises a 2-step grid

    key = jax.random.PRNGKey(0)
    kx, kp = jax.random.split(key)
    x = jax.random.normal(kx, (batch, obs_size), jnp.float32)
    w1, b1, w2, b2 = init_params(kp, obs_size, hidden_size, n_actions)

    # Parameter prep happens once, outside the jitted forward.
    params = prepare_params(w1, b1, w2, b2)

    fwd = jax.jit(net_forward)
    out = fwd(x, *params)
    jax.block_until_ready(out)

    # Plain-JAX reference (same f32 math; MXU accumulation may differ in last ulp).
    ref = jnp.maximum(x @ w1 + b1, 0.0) @ w2 + b2
    assert out.shape == (batch, n_actions)
    assert jnp.allclose(out, ref, atol=1e-5, rtol=1e-5)

    print("KERNEL_OK")
</pallas_src>

<mosaic_0001>
module attributes {stable_mosaic.version = 11 : i64} {
  func.func @_mlp_kernel(%arg0: i32, %arg1: memref<32x4xf32, #tpu.memory_space<vmem>>, %arg2: memref<4x128xf32, #tpu.memory_space<vmem>>, %arg3: memref<1x128xf32, #tpu.memory_space<vmem>>, %arg4: memref<128x10xf32, #tpu.memory_space<vmem>>, %arg5: memref<1x10xf32, #tpu.memory_space<vmem>>, %arg6: memref<32x10xf32, #tpu.memory_space<vmem>>) attributes {dimension_semantics = [#tpu.dimension_semantics<parallel>], iteration_bounds = array<i64: 2>, scalar_prefetch = 0 : i64, scratch_operands = 0 : i64, tpu.core_type = #tpu.core_type<tc>, window_params = [{transform_indices = @transform_0, window_bounds = array<i64: 32, 4>}, {pipeline_mode = #tpu.pipeline_mode<synchronous>, transform_indices = @transform_1, window_bounds = array<i64: 4, 128>}, {pipeline_mode = #tpu.pipeline_mode<synchronous>, transform_indices = @transform_2, window_bounds = array<i64: 1, 128>}, {pipeline_mode = #tpu.pipeline_mode<synchronous>, transform_indices = @transform_3, window_bounds = array<i64: 128, 10>}, {pipeline_mode = #tpu.pipeline_mode<synchronous>, transform_indices = @transform_4, window_bounds = array<i64: 1, 10>}, {transform_indices = @transform_5, window_bounds = array<i64: 32, 10>}]} {
    %c0 = arith.constant 0 : index
    %c0_0 = arith.constant 0 : index
    %0 = vector.load %arg1[%c0, %c0_0] : memref<32x4xf32, #tpu.memory_space<vmem>>, vector<32x4xf32>
    %c0_1 = arith.constant 0 : index
    %c0_2 = arith.constant 0 : index
    %1 = vector.load %arg2[%c0_1, %c0_2] : memref<4x128xf32, #tpu.memory_space<vmem>>, vector<4x128xf32>
    %cst = arith.constant dense<0.000000e+00> : vector<32x128xf32>
    %2 = tpu.matmul %0, %1, %cst {dimension_numbers = #tpu.dot_dimension_numbers<[1], [0], [0], [1], [0, 0, 1, 1], [], []>} : vector<32x4xf32>, vector<4x128xf32>, vector<32x128xf32> -> vector<32x128xf32>
    %c0_3 = arith.constant 0 : index
    %c0_4 = arith.constant 0 : index
    %3 = vector.load %arg3[%c0_3, %c0_4] : memref<1x128xf32, #tpu.memory_space<vmem>>, vector<1x128xf32>
    %4 = vector.broadcast %3 : vector<1x128xf32> to vector<32x128xf32>
    %5 = arith.addf %2, %4 : vector<32x128xf32>
    %cst_5 = arith.constant 0.000000e+00 : f32
    %6 = vector.broadcast %cst_5 : f32 to vector<32x128xf32>
    %7 = arith.maximumf %5, %6 : vector<32x128xf32>
    %c0_6 = arith.constant 0 : index
    %c0_7 = arith.constant 0 : index
    %8 = vector.load %arg4[%c0_6, %c0_7] : memref<128x10xf32, #tpu.memory_space<vmem>>, vector<128x10xf32>
    %cst_8 = arith.constant dense<0.000000e+00> : vector<32x10xf32>
    %9 = tpu.matmul %7, %8, %cst_8 {dimension_numbers = #tpu.dot_dimension_numbers<[1], [0], [0], [1], [0, 0, 1, 1], [], []>} : vector<32x128xf32>, vector<128x10xf32>, vector<32x10xf32> -> vector<32x10xf32>
    %c0_9 = arith.constant 0 : index
    %c0_10 = arith.constant 0 : index
    %10 = vector.load %arg5[%c0_9, %c0_10] : memref<1x10xf32, #tpu.memory_space<vmem>>, vector<1x10xf32>
    %11 = vector.broadcast %10 : vector<1x10xf32> to vector<32x10xf32>
    %12 = arith.addf %9, %11 : vector<32x10xf32>
    %c0_11 = arith.constant 0 : index
    %c0_12 = arith.constant 0 : index
    %13 = vector.load %arg6[%c0_11, %c0_12] : memref<32x10xf32, #tpu.memory_space<vmem>>, vector<32x10xf32>
    tpu.vector_store %arg6[%c0_11, %c0_12], %12 {strides = array<i32>} : memref<32x10xf32, #tpu.memory_space<vmem>>, vector<32x10xf32>,
    return
  }
  func.func @transform_0(%arg0: i32) -> (i32, i32) {
    %c0_i32 = arith.constant 0 : i32
    %c0_i32_0 = arith.constant 0 : i32
    return %arg0, %c0_i32 : i32, i32
  }
  func.func @transform_1(%arg0: i32) -> (i32, i32) {
    %c0_i32 = arith.constant 0 : i32
    %c0_i32_0 = arith.constant 0 : i32
    %c0_i32_1 = arith.constant 0 : i32
    return %c0_i32, %c0_i32_0 : i32, i32
  }
  func.func @transform_2(%arg0: i32) -> (i32, i32) {
    %c0_i32 = arith.constant 0 : i32
    %c0_i32_0 = arith.constant 0 : i32
    %c0_i32_1 = arith.constant 0 : i32
    return %c0_i32, %c0_i32_0 : i32, i32
  }
  func.func @transform_3(%arg0: i32) -> (i32, i32) {
    %c0_i32 = arith.constant 0 : i32
    %c0_i32_0 = arith.constant 0 : i32
    %c0_i32_1 = arith.constant 0 : i32
    return %c0_i32, %c0_i32_0 : i32, i32
  }
  func.func @transform_4(%arg0: i32) -> (i32, i32) {
    %c0_i32 = arith.constant 0 : i32
    %c0_i32_0 = arith.constant 0 : i32
    %c0_i32_1 = arith.constant 0 : i32
    return %c0_i32, %c0_i32_0 : i32, i32
  }
  func.func @transform_5(%arg0: i32) -> (i32, i32) {
    %c0_i32 = arith.constant 0 : i32
    %c0_i32_0 = arith.constant 0 : i32
    return %arg0, %c0_i32 : i32, i32
  }
}

</mosaic_0001>

<bundles_post_ra>
// kernel: net_forward.1
= control target key start
LH: loop header
LB: loop body
LE: loop exit
PB: predicated region body
PF: predicated region fallthrough
CT: control target
= control target key end

     0   :  { %s509_s18 = smov 0   ;;  %s600_s0 = inlined_call_operand.vmem [shape: f32[64,4], index: 0, kind: input, shape index: {}]   ;;  %s601_s1 = inlined_call_operand.vmem [shape: f32[4,128], index: 1, kind: input, shape index: {}]   ;;  %s602_s2 = inlined_call_operand.vmem [shape: f32[1,128], index: 2, kind: input, shape index: {}]   ;;  %s603_s3 = inlined_call_operand.vmem [shape: f32[128,10], index: 3, kind: input, shape index: {}]   ;;  %s604_s4 = inlined_call_operand.vmem [shape: f32[1,10], index: 4, kind: input, shape index: {}]   ;;  %s605_s5 = inlined_call_operand.vmem [shape: f32[64,10], index: 5, kind: output, shape index: {}]  }
   0x1 LB: > { %s397_s19 = sadd.s32 4294967295, %s477_s18   ;;  %p401_p0 = scmp.ge.s32.totalorder %s477_s18, 1  ;;  %s477_s18 = sphi %s509_s18, %s15_s18  }
   0x2   : > { %p188_p1 = scmp.lt.s32.totalorder %s477_s18, 3 }
   0x4   : > { %p189_p2 = pnand %p401_p0, %p188_p1 }
   0x5   : > { %s402_s22 = sshll.u32 (!%p189_p2), %s397_s19, 2 }
   0x6   : > { %192 = sbr.rel (%p189_p2) target bundleno = 308 (0x134), region = 40  ;;  %p217_p3 = scmp.lt.s32.totalorder (!%p189_p2), %s402_s22, 7 }
   0xb   : > { %v232_v0 = vld [vmem:[%s601_s1] sm:$0xf]  ;;  %vm250_vm0 = vcmask 1043456   ;;  %v302_v1 = vld [vmem:[%s603_s3 + $0x78] sm:$0xff]  ;;  %v301_v2 = vld [vmem:[%s603_s3 + $0x70] sm:$0xff]  ;;  %s607_s22 = smov (!%p217_p3, %s402_s22), 7 }
   0xc   : > { %406 = vmatpush.msk.msra.mxu0 %vm250_vm0, %v232_v0  ;;  %413 = vmatpush.msra.mxu1 %v302_v1  ;;  %v300_v3 = vld [vmem:[%s603_s3 + $0x68] sm:$0xff]  ;;  %s403_s29 = sshll.u32 %s607_s22, 3  ;;  %vm237_vm1 = vcmask 31744   ;;  %v299_v4 = vld [vmem:[%s603_s3 + $0x60] sm:$0xff]  ;;  %v298_v6 = vld [vmem:[%s603_s3 + $0x58] sm:$0xff]  ;;  %vm336_vm2 = vcmask 80896  }
   0xd   : > { %414 = vmatpush.msra.mxu2 %v302_v1  ;;  %415 = vmatpush.msra.mxu3 %v302_v1  ;;  %s537_s7 = scalar_lea.vmem %s600_s0, %s403_s29  ;;  %v297_v7 = vld [vmem:[%s603_s3 + $0x50] sm:$0xff]  ;;  %v296_v8 = vld [vmem:[%s603_s3 + $0x48] sm:$0xff]  ;;  %v295_v10 = vld [vmem:[%s603_s3 + $0x40] sm:$0xff]  ;;  %s226_s19 = scalar_lea.vmem %s605_s5, %s403_s29 }
   0xe   : > { %307 = vmatpush.msrb.mxu0 %v302_v1  ;;  %416 = vmatpush.msra.mxu1 %v301_v2  ;;  %v228_v5 = vld [vmem:[%s537_s7] sm:$0xff]  ;;  %v229_v9 = vld [vmem:[%s537_s7 + $0x8] sm:$0xff]  ;;  %v294_v11 = vld [vmem:[%s603_s3 + $0x38] sm:$0xff] }
   0xf   : > { %417 = vmatpush.msra.mxu2 %v301_v2  ;;  %418 = vmatpush.msra.mxu3 %v301_v2  ;;  %v293_v12 = vld [vmem:[%s603_s3 + $0x30] sm:$0xff]  ;;  %v292_v13 = vld [vmem:[%s603_s3 + $0x28] sm:$0xff]  ;;  %v291_v15 = vld [vmem:[%s603_s3 + $0x20] sm:$0xff] }
  0x10   : > { %308 = vmatpush.msrb.mxu0 %v301_v2  ;;  %419 = vmatpush.msra.mxu1 %v300_v3  ;;  %v230_v14 = vld [vmem:[%s537_s7 + $0x10] sm:$0xff]  ;;  %v290_v16 = vld [vmem:[%s603_s3 + $0x18] sm:$0xff]  ;;  %v288_v19 = vld [vmem:[%s603_s3 + $0x8] sm:$0xff] }
  0x11   : > { %420 = vmatpush.msra.mxu2 %v300_v3  ;;  %421 = vmatpush.msra.mxu3 %v300_v3  ;;  %v231_v17 = vld [vmem:[%s537_s7 + $0x18] sm:$0xff]  ;;  %v289_v18 = vld [vmem:[%s603_s3 + $0x10] sm:$0xff]  ;;  %v287_v20 = vld [vmem:[%s603_s3] sm:$0xff] }
  0x12   : > { %309 = vmatpush.msrb.mxu0 %v300_v3  ;;  %422 = vmatpush.msra.mxu1 %v299_v4  ;;  %v469_v21 = vld [vmem:[%s602_s2] ss:$0 sm:$0xff] }
  0x13   : > { %407 = vmatmul.msk.f32.vlgmr.msra.gmra.mxu0 %vm237_vm1, %v228_v5  ;;  %423 = vmatpush.msra.mxu2 %v299_v4  ;;  %v470_v34 = vld [vmem:[%s604_s4] ss:$0 sm:$0xff] }
  0x14   : > { %310 = vmatpush.msrb.mxu0 %v299_v4  ;;  %425 = vmatpush.msra.mxu1 %v298_v6 }
  0x15   : > { %426 = vmatpush.msra.mxu2 %v298_v6  ;;  %424 = vmatpush.msra.mxu3 %v299_v4 }
  0x16   : > { %311 = vmatpush.msrb.mxu0 %v298_v6  ;;  %428 = vmatpush.msra.mxu1 %v297_v7 }
  0x17   : > { %429 = vmatpush.msra.mxu2 %v297_v7  ;;  %427 = vmatpush.msra.mxu3 %v298_v6 }
  0x18   : > { %312 = vmatpush.msrb.mxu0 %v297_v7  ;;  %431 = vmatpush.msra.mxu1 %v296_v8 }
  0x19   : > { %432 = vmatpush.msra.mxu2 %v296_v8  ;;  %430 = vmatpush.msra.mxu3 %v297_v7 }
  0x1a   : > { %313 = vmatpush.msrb.mxu0 %v296_v8  ;;  %434 = vmatpush.msra.mxu1 %v295_v10 }
  0x1b   : > { %408 = vmatmul.msk.f32.gmra.mxu0 %vm237_vm1, %v229_v9  ;;  %435 = vmatpush.msra.mxu2 %v295_v10 }
  0x1c   : > { %314 = vmatpush.msrb.mxu0 %v295_v10  ;;  %437 = vmatpush.msra.mxu1 %v294_v11 }
  0x1d   : > { %438 = vmatpush.msra.mxu2 %v294_v11  ;;  %433 = vmatpush.msra.mxu3 %v296_v8 }
  0x1e   : > { %315 = vmatpush.msrb.mxu0 %v294_v11  ;;  %440 = vmatpush.msra.mxu1 %v293_v12 }
  0x1f   : > { %441 = vmatpush.msra.mxu2 %v293_v12  ;;  %436 = vmatpush.msra.mxu3 %v295_v10 }
  0x20   : > { %316 = vmatpush.msrb.mxu0 %v293_v12  ;;  %443 = vmatpush.msra.mxu1 %v292_v13 }
  0x21   : > { %444 = vmatpush.msra.mxu2 %v292_v13  ;;  %439 = vmatpush.msra.mxu3 %v294_v11 }
  0x22   : > { %317 = vmatpush.msrb.mxu0 %v292_v13  ;;  %446 = vmatpush.msra.mxu1 %v291_v15 }
  0x23   : > { %409 = vmatmul.msk.f32.gmra.mxu0 %vm237_vm1, %v230_v14  ;;  %447 = vmatpush.msra.mxu2 %v291_v15 }
  0x24   : > { %318 = vmatpush.msrb.mxu0 %v291_v15  ;;  %449 = vmatpush.msra.mxu1 %v290_v16 }
  0x25   : > { %450 = vmatpush.msra.mxu2 %v290_v16  ;;  %442 = vmatpush.msra.mxu3 %v293_v12 }
  0x26   : > { %319 = vmatpush.msrb.mxu0 %v290_v16  ;;  %452 = vmatpush.msra.mxu1 %v289_v18 }
  0x27   : > { %445 = vmatpush.msra.mxu3 %v292_v13  ;;  %453 = vmatpush.msra.mxu2 %v289_v18 }
  0x28   : > { %320 = vmatpush.msrb.mxu0 %v289_v18  ;;  %455 = vmatpush.msra.mxu1 %v288_v19 }
  0x29   : > { %448 = vmatpush.msra.mxu3 %v291_v15  ;;  %456 = vmatpush.msra.mxu2 %v288_v19 }
  0x2a   : > { %321 = vmatpush.msrb.mxu0 %v288_v19  ;;  %458 = vmatpush.msra.mxu1 %v287_v20 }
  0x2b   : > { %410 = vmatmul.msk.f32.gmra.mxu0 %vm237_vm1, %v231_v17  ;;  %451 = vmatpush.msra.mxu3 %v290_v16 }
  0x2c   : > { %322 = vmatpush.msrb.mxu0 %v287_v20  ;;  %459 = vmatpush.msra.mxu2 %v287_v20 }
  0x2d   : > { %454 = vmatpush.msra.mxu3 %v289_v18 }
  0x2f   : > { %457 = vmatpush.msra.mxu3 %v288_v19 }
  0x31   : > { %460 = vmatpush.msra.mxu3 %v287_v20 }
  0x90   : > { %v271_v22 = vpop.f32.mrf.mxu0 }
  0x91   : > { %v272_v23 = vadd.f32 %v469_v21, %v271_v22 }
  0x93   : > { %v283_v24 = vmax.f32 %v272_v23, 0.0 }
  0x95   : > { %323 = vmatmul.f32.vlgmr.msrb.gmra.mxu0 %v283_v24 }
  0x98   : > { %v274_v25 = vpop.f32.mrf.mxu0 }
  0x99   : > { %v275_v26 = vadd.f32 %v469_v21, %v274_v25 }
  0x9b   : > { %v284_v27 = vmax.f32 %v275_v26, 0.0 }
  0x9d   : > { %326 = vmatmul.f32.vlgmr.msra.gmra.mxu1 %v284_v27 }
  0xa0   : > { %v277_v28 = vpop.f32.mrf.mxu0 }
  0xa1   : > { %v278_v29 = vadd.f32 %v469_v21, %v277_v28 }
  0xa3   : > { %v285_v30 = vmax.f32 %v278_v29, 0.0 }
  0xa5   : > { %329 = vmatmul.f32.vlgmr.msra.gmra.mxu2 %v285_v30 }
  0xa8   : > { %v280_v31 = vpop.f32.mrf.mxu0 }
  0xa9   : > { %v281_v32 = vadd.f32 %v469_v21, %v280_v31 }
  0xab   : > { %v286_v33 = vmax.f32 %v281_v32, 0.0 }
  0xad   : > { %332 = vmatmul.f32.vlgmr.msra.gmra.mxu3 %v286_v33 }
 0x112   : > { %v324_v35 = vpop.f32.mrf.mxu0 }
 0x113   : > { %v325_v36 = vadd.f32 %v470_v34, %v324_v35 }
 0x115   : > { %337 = vst.msk [vmem:[%s226_s19] sm:$0xff] %vm336_vm2, %v325_v36 }
 0x11a   : > { %v327_v37 = vpop.f32.mrf.mxu1 }
 0x11b   : > { %v328_v38 = vadd.f32 %v470_v34, %v327_v37 }
 0x11d   : > { %338 = vst.msk [vmem:[%s226_s19 + $0x8] sm:$0xff] %vm336_vm2, %v328_v38 }
 0x128   : > { %v330_v39 = vpop.f32.mrf.mxu2 }
 0x129   : > { %v331_v40 = vadd.f32 %v470_v34, %v330_v39 }
 0x12b   : > { %339 = vst.msk [vmem:[%s226_s19 + $0x10] sm:$0xff] %vm336_vm2, %v331_v40 }
 0x130   : > { %v333_v41 = vpop.f32.mrf.mxu3 }
 0x131   : > { %v334_v42 = vadd.f32 %v470_v34, %v333_v41 }
 0x133   : > { %340 = vst.msk [vmem:[%s226_s19 + $0x18] sm:$0xff] %vm336_vm2, %v334_v42 }
 0x134 PF: > { %s15_s18 = sadd.s32 1, %s477_s18  }
 0x135   : > { %p12_p4 = scmp.ge.s32.totalorder %s15_s18, 4  }
 0x137   :  { %14 = sbr.rel (!%p12_p4) target bundleno = 1 (0x1), region = 70 }

</bundles_post_ra>
